<compile_context>
chip_gen: v7x
topology: tpu7x:2x2x1
jax: 0.10.0
libtpu: 0.0.40
codegen_flags: <defaults>
</compile_context>

<pallas_src>
import functools

import jax
import jax.numpy as jnp
from jax.experimental import pallas as pl
from jax.experimental.pallas import tpu as pltpu

_INV_SQRT2 = 0.7071067811865476
_SQRT_2_OVER_PI = 0.7978845608028654


def _round_up(x, m):
    return ((x + m - 1) // m) * m


def _conv_pos_embed_kernel(*refs, tn, hb, pad, ksize, n_total, has_mask,
                           center_ragged, right_gate_start, approx_gelu):
    # Refs (mask variant):    xc, xl, xr, mc, ml, mr, w, b | o | xs
    # Refs (no-mask variant): xc, xl, xr,             w, b | o | xs
    #   xc: (1, TN, C) current tile       xl/xr: (1, HB, C) left/right halo blocks
    #   mc/ml/mr: matching (.., 1) float masks      w: (K, C)   b: (1, C)
    #   o: (1, TN, C) output              xs: (TN + 2*HB, C) f32 scratch window
    if has_mask:
        xc, xl, xr, mc, ml, mr, w, b, o, xs = refs
    else:
        xc, xl, xr, w, b, o, xs = refs
        mc = ml = mr = None

    j = pl.program_id(1)
    nj = pl.num_programs(1)
    base = j * tn  # global sequence index of the first row of this tile

    # ---------------- center piece: global rows [base, base+tn) -> xs[hb:hb+tn) ------
    xcv = xc[0].astype(jnp.float32)
    m_keep = None
    if has_mask:
        m_keep = mc[0] != 0                      # (tn, 1) bool; loaded/compared once,
        xcv = jnp.where(m_keep, xcv, 0.0)        # reused for the post-GELU masked_fill.
    if center_ragged:
        @pl.when(j == nj - 1)
        def _():
            ridx = base + jax.lax.broadcasted_iota(jnp.int32, (tn, 1), 0)
            xs[hb:hb + tn, :] = jnp.where(ridx < n_total, xcv, 0.0)

        @pl.when(j != nj - 1)
        def _():
            xs[hb:hb + tn, :] = xcv
    else:
        xs[hb:hb + tn, :] = xcv

    # ---------------- left halo: global rows [base-hb, base) -> xs[0:hb) -------------
    xlv = xl[0].astype(jnp.float32)
    if has_mask:
        xlv = jnp.where(ml[0] != 0, xlv, 0.0)

    @pl.when(j == 0)
    def _():
        ridx = (base - hb) + jax.lax.broadcasted_iota(jnp.int32, (hb, 1), 0)
        xs[0:hb, :] = jnp.where(ridx >= 0, xlv, 0.0)

    @pl.when(j != 0)
    def _():
        xs[0:hb, :] = xlv

    # ---------------- right halo: global rows [base+tn, base+tn+hb) ------------------
    xrv = xr[0].astype(jnp.float32)
    if has_mask:
        xrv = jnp.where(mr[0] != 0, xrv, 0.0)

    @pl.when(j >= right_gate_start)
    def _():
        ridx = (base + tn) + jax.lax.broadcasted_iota(jnp.int32, (hb, 1), 0)
        xs[hb + tn:hb + tn + hb, :] = jnp.where(ridx < n_total, xrv, 0.0)

    @pl.when(j < right_gate_start)
    def _():
        xs[hb + tn:hb + tn + hb, :] = xrv

    # ---------------- depthwise conv: K shifted multiply-accumulates -----------------
    acc = xs[hb - pad:hb - pad + tn, :] * w[0, :].astype(jnp.float32)
    for k in range(1, ksize):                     # static, small K
        off = hb - pad + k
        acc = acc + xs[off:off + tn, :] * w[k, :].astype(jnp.float32)
    acc = acc + b[...].astype(jnp.float32)        # (1, C) broadcast inside the add

    # ---------------- GELU -----------------------------------------------------------
    if approx_gelu:
        inner = _SQRT_2_OVER_PI * (acc + 0.044715 * acc * acc * acc)
        g = 0.5 * acc * (1.0 + jnp.tanh(inner))   # tanh runs on the EUP slot
    else:
        g = 0.5 * acc * (1.0 + jax.lax.erf(acc * _INV_SQRT2))  # exact nn.GELU()

    if has_mask:
        g = jnp.where(m_keep, g, 0.0)             # fused post-conv masked_fill (reused)
    o[0] = g.astype(o.dtype)


def conv_position_embed(x, weight, bias, mask=None, *, tile_n=None,
                        vmem_budget_bytes=12 * 1024 * 1024,
                        vmem_limit_bytes=32 * 1024 * 1024,
                        approximate_gelu=False):
    """x: (B, N, C); weight: (K, C) (= torch (C,1,K) transposed); bias: (C,);
    mask: optional (B, N) bool."""
    B, N, C = x.shape
    K, Cw = weight.shape
    assert Cw == C and K % 2 == 1
    pad = K // 2
    hb = _round_up(max(pad, 1), 8)          # halo block rows (sublane aligned, >= pad)

    # Pick TN: ~5 f32 (TN, C) tiles dominate VMEM (x in x2, out x2, scratch x1).
    if tile_n is None:
        tn = max(hb, ((vmem_budget_bytes // (20 * C)) // hb) * hb)
        tn = min(tn, 2048)
        if B == 1:
            # v7x has 2 TCs: make sure there are >= 2 parallel grid steps when B == 1.
            half = _round_up(pl.cdiv(N, 2), hb)
            if hb <= half < tn:
                tn = half
    else:
        tn = max(hb, _round_up(tile_n, hb))
    tn = min(tn, _round_up(N, hb))

    n_tiles = pl.cdiv(N, tn)
    stride = tn // hb                        # halo-blocks per tile
    nhb = pl.cdiv(N, hb)                     # number of halo-sized blocks along N

    # Edge-gating thresholds (static): interior tiles skip all iota/range gating.
    center_ragged = bool(N % tn != 0)
    right_gate_start = max(0, (N - hb) // tn)  # first j where right halo exceeds N

    bias2d = bias.reshape(1, C)

    x_spec_c = pl.BlockSpec((1, tn, C), lambda b, j: (b, j, 0))
    x_spec_l = pl.BlockSpec((1, hb, C),
                            lambda b, j: (b, jnp.maximum(j * stride - 1, 0), 0))
    x_spec_r = pl.BlockSpec((1, hb, C),
                            lambda b, j: (b, jnp.minimum((j + 1) * stride, nhb - 1), 0))
    w_spec = pl.BlockSpec((K, C), lambda b, j: (0, 0))
    b_spec = pl.BlockSpec((1, C), lambda b, j: (0, 0))
    out_spec = pl.BlockSpec((1, tn, C), lambda b, j: (b, j, 0))

    has_mask = mask is not None
    if has_mask:
        # Tiny (B, N, 1) float mask: negligible HBM traffic vs x (1/C of it).
        mask_f = mask.astype(jnp.float32)[..., None]
        m_spec_c = pl.BlockSpec((1, tn, 1), lambda b, j: (b, j, 0))
        m_spec_l = pl.BlockSpec((1, hb, 1),
                                lambda b, j: (b, jnp.maximum(j * stride - 1, 0), 0))
        m_spec_r = pl.BlockSpec((1, hb, 1),
                                lambda b, j: (b, jnp.minimum((j + 1) * stride, nhb - 1), 0))
        in_specs = [x_spec_c, x_spec_l, x_spec_r, m_spec_c, m_spec_l, m_spec_r,
                    w_spec, b_spec]
        operands = (x, x, x, mask_f, mask_f, mask_f, weight, bias2d)
    else:
        in_specs = [x_spec_c, x_spec_l, x_spec_r, w_spec, b_spec]
        operands = (x, x, x, weight, bias2d)

    kernel = functools.partial(
        _conv_pos_embed_kernel, tn=tn, hb=hb, pad=pad, ksize=K, n_total=N,
        has_mask=has_mask, center_ragged=center_ragged,
        right_gate_start=right_gate_start, approx_gelu=approximate_gelu)

    return pl.pallas_call(
        kernel,
        out_shape=jax.ShapeDtypeStruct((B, N, C), x.dtype),
        grid=(B, n_tiles),
        in_specs=in_specs,
        out_specs=out_spec,
        scratch_shapes=[pltpu.VMEM((tn + 2 * hb, C), jnp.float32)],
        compiler_params=pltpu.CompilerParams(
            dimension_semantics=("parallel", "parallel"),
            vmem_limit_bytes=vmem_limit_bytes),
    )(*operands)


def _reference(x, weight, bias, mask=None):
    B, N, C = x.shape
    K = weight.shape[0]
    pad = K // 2
    xf = x.astype(jnp.float32)
    if mask is not None:
        xf = jnp.where(mask[..., None], xf, 0.0)
    xp = jnp.pad(xf, ((0, 0), (pad, pad), (0, 0)))
    acc = jnp.broadcast_to(bias.astype(jnp.float32), (B, N, C))
    for k in range(K):
        acc = acc + xp[:, k:k + N, :] * weight[k, :].astype(jnp.float32)
    out = 0.5 * acc * (1.0 + jax.lax.erf(acc * _INV_SQRT2))
    if mask is not None:
        out = jnp.where(mask[..., None], out, 0.0)
    return out.astype(x.dtype)


if __name__ == "__main__":
    key = jax.random.PRNGKey(0)

    # --- Test 1: small shapes from the module (batch=2, seq=8, dim=32, K=7) ---------
    B, N, DIM, K = 2, 8, 32, 7
    kx, kw, kb, km, key = jax.random.split(key, 5)
    x = jax.random.normal(kx, (B, N, DIM), dtype=jnp.float32)
    fan_in = 1 * K
    bound = 1.0 / (fan_in ** 0.5)
    weight = jax.random.uniform(kw, (K, DIM), jnp.float32, -bound, bound)
    bias = jax.random.uniform(kb, (DIM,), jnp.float32, -bound, bound)
    mask = jax.random.bernoulli(km, 0.8, (B, N))

    out = conv_position_embed(x, weight, bias, mask=mask)
    jax.block_until_ready(out)
    assert float(jnp.max(jnp.abs(out - _reference(x, weight, bias, mask)))) < 1e-4

    out_nomask = conv_position_embed(x, weight, bias, mask=None)
    jax.block_until_ready(out_nomask)
    assert float(jnp.max(jnp.abs(out_nomask - _reference(x, weight, bias)))) < 1e-4

    # --- Test 2: multi-tile + ragged N + lane-dense C, exercises halo/gating logic ---
    B2, N2, DIM2 = 2, 41, 128
    kx2, kw2, kb2, km2, key = jax.random.split(key, 5)
    x2 = jax.random.normal(kx2, (B2, N2, DIM2), dtype=jnp.float32)
    weight2 = jax.random.uniform(kw2, (K, DIM2), jnp.float32, -bound, bound)
    bias2 = jax.random.uniform(kb2, (DIM2,), jnp.float32, -bound, bound)
    mask2 = jax.random.bernoulli(km2, 0.8, (B2, N2))

    out2 = conv_position_embed(x2, weight2, bias2, mask=mask2, tile_n=16)
    jax.block_until_ready(out2)
    assert float(jnp.max(jnp.abs(out2 - _reference(x2, weight2, bias2, mask2)))) < 1e-4

    out2_nm = conv_position_embed(x2, weight2, bias2, mask=None, tile_n=16)
    jax.block_until_ready(out2_nm)
    assert float(jnp.max(jnp.abs(out2_nm - _reference(x2, weight2, bias2)))) < 1e-4

    # --- Test 3: B=1 path (v7x grid-balance tn cap) ----------------------------------
    B3, N3, DIM3 = 1, 40, 128
    kx3, km3, key = jax.random.split(key, 3)
    x3 = jax.random.normal(kx3, (B3, N3, DIM3), dtype=jnp.float32)
    mask3 = jax.random.bernoulli(km3, 0.8, (B3, N3))
    out3 = conv_position_embed(x3, weight2, bias2, mask=mask3)
    jax.block_until_ready(out3)
    assert float(jnp.max(jnp.abs(out3 - _reference(x3, weight2, bias2, mask3)))) < 1e-4

    print("KERNEL_OK")
</pallas_src>

<mosaic_0001>
module attributes {stable_mosaic.version = 11 : i64} {
  func.func @_conv_pos_embed_kernel(%arg0: i32, %arg1: i32, %arg2: memref<1x8x32xf32, #tpu.memory_space<vmem>>, %arg3: memref<1x8x32xf32, #tpu.memory_space<vmem>>, %arg4: memref<1x8x32xf32, #tpu.memory_space<vmem>>, %arg5: memref<1x8x1xf32, #tpu.memory_space<vmem>>, %arg6: memref<1x8x1xf32, #tpu.memory_space<vmem>>, %arg7: memref<1x8x1xf32, #tpu.memory_space<vmem>>, %arg8: memref<7x32xf32, #tpu.memory_space<vmem>>, %arg9: memref<1x32xf32, #tpu.memory_space<vmem>>, %arg10: memref<1x8x32xf32, #tpu.memory_space<vmem>>, %arg11: memref<24x32xf32, #tpu.memory_space<vmem>>) attributes {dimension_semantics = [#tpu.dimension_semantics<parallel>, #tpu.dimension_semantics<parallel>], iteration_bounds = array<i64: 2, 1>, scalar_prefetch = 0 : i64, scratch_operands = 1 : i64, tpu.core_type = #tpu.core_type<tc>, window_params = [{transform_indices = @transform_0, window_bounds = array<i64: 1, 8, 32>}, {transform_indices = @transform_1, window_bounds = array<i64: 1, 8, 32>}, {transform_indices = @transform_2, window_bounds = array<i64: 1, 8, 32>}, {transform_indices = @transform_3, window_bounds = array<i64: 1, 8, 1>}, {transform_indices = @transform_4, window_bounds = array<i64: 1, 8, 1>}, {transform_indices = @transform_5, window_bounds = array<i64: 1, 8, 1>}, {pipeline_mode = #tpu.pipeline_mode<synchronous>, transform_indices = @transform_6, window_bounds = array<i64: 7, 32>}, {pipeline_mode = #tpu.pipeline_mode<synchronous>, transform_indices = @transform_7, window_bounds = array<i64: 1, 32>}, {transform_indices = @transform_8, window_bounds = array<i64: 1, 8, 32>}]} {
    %c8_i32 = arith.constant 8 : i32
    %0 = arith.muli %arg1, %c8_i32 : i32
    %c0 = arith.constant 0 : index
    %c0_0 = arith.constant 0 : index
    %c0_1 = arith.constant 0 : index
    %1 = vector.load %arg2[%c0, %c0_0, %c0_1] : memref<1x8x32xf32, #tpu.memory_space<vmem>>, vector<1x8x32xf32>
    %2 = vector.shape_cast %1 : vector<1x8x32xf32> to vector<8x32xf32>
    %c0_2 = arith.constant 0 : index
    %c0_3 = arith.constant 0 : index
    %c0_4 = arith.constant 0 : index
    %3 = vector.load %arg5[%c0_2, %c0_3, %c0_4] : memref<1x8x1xf32, #tpu.memory_space<vmem>>, vector<1x8x1xf32>
    %4 = vector.shape_cast %3 : vector<1x8x1xf32> to vector<8x1xf32>
    %cst = arith.constant 0.000000e+00 : f32
    %5 = vector.broadcast %cst : f32 to vector<8x1xf32>
    %6 = arith.cmpf one, %4, %5 : vector<8x1xf32>
    %cst_5 = arith.constant 0.000000e+00 : f32
    %7 = vector.shape_cast %6 : vector<8x1xi1> to vector<8x1xi1>
    %8 = vector.broadcast %7 : vector<8x1xi1> to vector<8x32xi1>
    %9 = vector.broadcast %cst_5 : f32 to vector<8x32xf32>
    %10 = arith.select %8, %2, %9 : vector<8x32xi1>, vector<8x32xf32>
    %c8 = arith.constant 8 : index
    %c0_6 = arith.constant 0 : index
    %11 = vector.load %arg11[%c8, %c0_6] : memref<24x32xf32, #tpu.memory_space<vmem>>, vector<8x32xf32>
    tpu.vector_store %arg11[%c8, %c0_6], %10 {strides = array<i32>} : memref<24x32xf32, #tpu.memory_space<vmem>>, vector<8x32xf32>,
    %c0_7 = arith.constant 0 : index
    %c0_8 = arith.constant 0 : index
    %c0_9 = arith.constant 0 : index
    %12 = vector.load %arg3[%c0_7, %c0_8, %c0_9] : memref<1x8x32xf32, #tpu.memory_space<vmem>>, vector<1x8x32xf32>
    %13 = vector.shape_cast %12 : vector<1x8x32xf32> to vector<8x32xf32>
    %c0_10 = arith.constant 0 : index
    %c0_11 = arith.constant 0 : index
    %c0_12 = arith.constant 0 : index
    %14 = vector.load %arg6[%c0_10, %c0_11, %c0_12] : memref<1x8x1xf32, #tpu.memory_space<vmem>>, vector<1x8x1xf32>
    %15 = vector.shape_cast %14 : vector<1x8x1xf32> to vector<8x1xf32>
    %cst_13 = arith.constant 0.000000e+00 : f32
    %16 = vector.broadcast %cst_13 : f32 to vector<8x1xf32>
    %17 = arith.cmpf one, %15, %16 : vector<8x1xf32>
    %cst_14 = arith.constant 0.000000e+00 : f32
    %18 = vector.shape_cast %17 : vector<8x1xi1> to vector<8x1xi1>
    %19 = vector.broadcast %18 : vector<8x1xi1> to vector<8x32xi1>
    %20 = vector.broadcast %cst_14 : f32 to vector<8x32xf32>
    %21 = arith.select %19, %13, %20 : vector<8x32xi1>, vector<8x32xf32>
    %c0_i32 = arith.constant 0 : i32
    %22 = arith.cmpi eq, %arg1, %c0_i32 : i32
    %23 = arith.extui %22 : i1 to i32
    %c0_i32_15 = arith.constant 0 : i32
    %24 = arith.cmpi ne, %23, %c0_i32_15 : i32
    scf.if %24 {
      %c8_i32_57 = arith.constant 8 : i32
      %110 = arith.subi %0, %c8_i32_57 : i32
      %111 = tpu.iota {dimensions = array<i32: 0>} : vector<8x1xi32>
      %112 = vector.broadcast %110 : i32 to vector<8x1xi32>
      %113 = arith.addi %112, %111 : vector<8x1xi32>
      %c0_i32_58 = arith.constant 0 : i32
      %114 = vector.broadcast %c0_i32_58 : i32 to vector<8x1xi32>
      %115 = arith.cmpi sge, %113, %114 : vector<8x1xi32>
      %cst_59 = arith.constant 0.000000e+00 : f32
      %116 = vector.shape_cast %115 : vector<8x1xi1> to vector<8x1xi1>
      %117 = vector.broadcast %116 : vector<8x1xi1> to vector<8x32xi1>
      %118 = vector.broadcast %cst_59 : f32 to vector<8x32xf32>
      %119 = arith.select %117, %21, %118 : vector<8x32xi1>, vector<8x32xf32>
      %c0_60 = arith.constant 0 : index
      %c0_61 = arith.constant 0 : index
      %120 = vector.load %arg11[%c0_60, %c0_61] : memref<24x32xf32, #tpu.memory_space<vmem>>, vector<8x32xf32>
      tpu.vector_store %arg11[%c0_60, %c0_61], %119 {strides = array<i32>} : memref<24x32xf32, #tpu.memory_space<vmem>>, vector<8x32xf32>,
    } else {
    }
    %c0_i32_16 = arith.constant 0 : i32
    %25 = arith.cmpi ne, %arg1, %c0_i32_16 : i32
    %26 = arith.extui %25 : i1 to i32
    %c0_i32_17 = arith.constant 0 : i32
    %27 = arith.cmpi ne, %26, %c0_i32_17 : i32
    scf.if %27 {
      %c0_57 = arith.constant 0 : index
      %c0_58 = arith.constant 0 : index
      %110 = vector.load %arg11[%c0_57, %c0_58] : memref<24x32xf32, #tpu.memory_space<vmem>>, vector<8x32xf32>
      tpu.vector_store %arg11[%c0_57, %c0_58], %21 {strides = array<i32>} : memref<24x32xf32, #tpu.memory_space<vmem>>, vector<8x32xf32>,
    } else {
    }
    %c0_18 = arith.constant 0 : index
    %c0_19 = arith.constant 0 : index
    %c0_20 = arith.constant 0 : index
    %28 = vector.load %arg4[%c0_18, %c0_19, %c0_20] : memref<1x8x32xf32, #tpu.memory_space<vmem>>, vector<1x8x32xf32>
    %29 = vector.shape_cast %28 : vector<1x8x32xf32> to vector<8x32xf32>
    %c0_21 = arith.constant 0 : index
    %c0_22 = arith.constant 0 : index
    %c0_23 = arith.constant 0 : index
    %30 = vector.load %arg7[%c0_21, %c0_22, %c0_23] : memref<1x8x1xf32, #tpu.memory_space<vmem>>, vector<1x8x1xf32>
    %31 = vector.shape_cast %30 : vector<1x8x1xf32> to vector<8x1xf32>
    %cst_24 = arith.constant 0.000000e+00 : f32
    %32 = vector.broadcast %cst_24 : f32 to vector<8x1xf32>
    %33 = arith.cmpf one, %31, %32 : vector<8x1xf32>
    %cst_25 = arith.constant 0.000000e+00 : f32
    %34 = vector.shape_cast %33 : vector<8x1xi1> to vector<8x1xi1>
    %35 = vector.broadcast %34 : vector<8x1xi1> to vector<8x32xi1>
    %36 = vector.broadcast %cst_25 : f32 to vector<8x32xf32>
    %37 = arith.select %35, %29, %36 : vector<8x32xi1>, vector<8x32xf32>
    %c0_i32_26 = arith.constant 0 : i32
    %38 = arith.cmpi sge, %arg1, %c0_i32_26 : i32
    %39 = arith.extui %38 : i1 to i32
    %c0_i32_27 = arith.constant 0 : i32
    %40 = arith.cmpi ne, %39, %c0_i32_27 : i32
    scf.if %40 {
      %c8_i32_57 = arith.constant 8 : i32
      %110 = arith.addi %0, %c8_i32_57 : i32
      %111 = tpu.iota {dimensions = array<i32: 0>} : vector<8x1xi32>
      %112 = vector.broadcast %110 : i32 to vector<8x1xi32>
      %113 = arith.addi %112, %111 : vector<8x1xi32>
      %c8_i32_58 = arith.constant 8 : i32
      %114 = vector.broadcast %c8_i32_58 : i32 to vector<8x1xi32>
      %115 = arith.cmpi slt, %113, %114 : vector<8x1xi32>
      %cst_59 = arith.constant 0.000000e+00 : f32
      %116 = vector.shape_cast %115 : vector<8x1xi1> to vector<8x1xi1>
      %117 = vector.broadcast %116 : vector<8x1xi1> to vector<8x32xi1>
      %118 = vector.broadcast %cst_59 : f32 to vector<8x32xf32>
      %119 = arith.select %117, %37, %118 : vector<8x32xi1>, vector<8x32xf32>
      %c16 = arith.constant 16 : index
      %c0_60 = arith.constant 0 : index
      %120 = vector.load %arg11[%c16, %c0_60] : memref<24x32xf32, #tpu.memory_space<vmem>>, vector<8x32xf32>
      tpu.vector_store %arg11[%c16, %c0_60], %119 {strides = array<i32>} : memref<24x32xf32, #tpu.memory_space<vmem>>, vector<8x32xf32>,
    } else {
    }
    %c0_i32_28 = arith.constant 0 : i32
    %41 = arith.cmpi slt, %arg1, %c0_i32_28 : i32
    %42 = arith.extui %41 : i1 to i32
    %c0_i32_29 = arith.constant 0 : i32
    %43 = arith.cmpi ne, %42, %c0_i32_29 : i32
    scf.if %43 {
      %c16 = arith.constant 16 : index
      %c0_57 = arith.constant 0 : index
      %110 = vector.load %arg11[%c16, %c0_57] : memref<24x32xf32, #tpu.memory_space<vmem>>, vector<8x32xf32>
      tpu.vector_store %arg11[%c16, %c0_57], %37 {strides = array<i32>} : memref<24x32xf32, #tpu.memory_space<vmem>>, vector<8x32xf32>,
    } else {
    }
    %c5 = arith.constant 5 : index
    %c0_30 = arith.constant 0 : index
    %44 = vector.load %arg11[%c5, %c0_30] : memref<24x32xf32, #tpu.memory_space<vmem>>, vector<8x32xf32>
    %c0_31 = arith.constant 0 : index
    %c0_32 = arith.constant 0 : index
    %45 = vector.load %arg8[%c0_31, %c0_32] : memref<7x32xf32, #tpu.memory_space<vmem>>, vector<1x32xf32>
    %46 = vector.shape_cast %45 : vector<1x32xf32> to vector<32xf32>
    %47 = vector.shape_cast %46 : vector<32xf32> to vector<1x32xf32>
    %48 = vector.broadcast %47 : vector<1x32xf32> to vector<8x32xf32>
    %49 = arith.mulf %44, %48 : vector<8x32xf32>
    %c6 = arith.constant 6 : index
    %c0_33 = arith.constant 0 : index
    %50 = vector.load %arg11[%c6, %c0_33] : memref<24x32xf32, #tpu.memory_space<vmem>>, vector<8x32xf32>
    %c1 = arith.constant 1 : index
    %c0_34 = arith.constant 0 : index
    %51 = vector.load %arg8[%c1, %c0_34] : memref<7x32xf32, #tpu.memory_space<vmem>>, vector<1x32xf32>
    %52 = vector.shape_cast %51 : vector<1x32xf32> to vector<32xf32>
    %53 = vector.shape_cast %52 : vector<32xf32> to vector<1x32xf32>
    %54 = vector.broadcast %53 : vector<1x32xf32> to vector<8x32xf32>
    %55 = arith.mulf %50, %54 : vector<8x32xf32>
    %56 = arith.addf %49, %55 : vector<8x32xf32>
    %c7 = arith.constant 7 : index
    %c0_35 = arith.constant 0 : index
    %57 = vector.load %arg11[%c7, %c0_35] : memref<24x32xf32, #tpu.memory_space<vmem>>, vector<8x32xf32>
    %c2 = arith.constant 2 : index
    %c0_36 = arith.constant 0 : index
    %58 = vector.load %arg8[%c2, %c0_36] : memref<7x32xf32, #tpu.memory_space<vmem>>, vector<1x32xf32>
    %59 = vector.shape_cast %58 : vector<1x32xf32> to vector<32xf32>
    %60 = vector.shape_cast %59 : vector<32xf32> to vector<1x32xf32>
    %61 = vector.broadcast %60 : vector<1x32xf32> to vector<8x32xf32>
    %62 = arith.mulf %57, %61 : vector<8x32xf32>
    %63 = arith.addf %56, %62 : vector<8x32xf32>
    %c8_37 = arith.constant 8 : index
    %c0_38 = arith.constant 0 : index
    %64 = vector.load %arg11[%c8_37, %c0_38] : memref<24x32xf32, #tpu.memory_space<vmem>>, vector<8x32xf32>
    %c3 = arith.constant 3 : index
    %c0_39 = arith.constant 0 : index
    %65 = vector.load %arg8[%c3, %c0_39] : memref<7x32xf32, #tpu.memory_space<vmem>>, vector<1x32xf32>
    %66 = vector.shape_cast %65 : vector<1x32xf32> to vector<32xf32>
    %67 = vector.shape_cast %66 : vector<32xf32> to vector<1x32xf32>
    %68 = vector.broadcast %67 : vector<1x32xf32> to vector<8x32xf32>
    %69 = arith.mulf %64, %68 : vector<8x32xf32>
    %70 = arith.addf %63, %69 : vector<8x32xf32>
    %c9 = arith.constant 9 : index
    %c0_40 = arith.constant 0 : index
    %71 = vector.load %arg11[%c9, %c0_40] : memref<24x32xf32, #tpu.memory_space<vmem>>, vector<8x32xf32>
    %c4 = arith.constant 4 : index
    %c0_41 = arith.constant 0 : index
    %72 = vector.load %arg8[%c4, %c0_41] : memref<7x32xf32, #tpu.memory_space<vmem>>, vector<1x32xf32>
    %73 = vector.shape_cast %72 : vector<1x32xf32> to vector<32xf32>
    %74 = vector.shape_cast %73 : vector<32xf32> to vector<1x32xf32>
    %75 = vector.broadcast %74 : vector<1x32xf32> to vector<8x32xf32>
    %76 = arith.mulf %71, %75 : vector<8x32xf32>
    %77 = arith.addf %70, %76 : vector<8x32xf32>
    %c10 = arith.constant 10 : index
    %c0_42 = arith.constant 0 : index
    %78 = vector.load %arg11[%c10, %c0_42] : memref<24x32xf32, #tpu.memory_space<vmem>>, vector<8x32xf32>
    %c5_43 = arith.constant 5 : index
    %c0_44 = arith.constant 0 : index
    %79 = vector.load %arg8[%c5_43, %c0_44] : memref<7x32xf32, #tpu.memory_space<vmem>>, vector<1x32xf32>
    %80 = vector.shape_cast %79 : vector<1x32xf32> to vector<32xf32>
    %81 = vector.shape_cast %80 : vector<32xf32> to vector<1x32xf32>
    %82 = vector.broadcast %81 : vector<1x32xf32> to vector<8x32xf32>
    %83 = arith.mulf %78, %82 : vector<8x32xf32>
    %84 = arith.addf %77, %83 : vector<8x32xf32>
    %c11 = arith.constant 11 : index
    %c0_45 = arith.constant 0 : index
    %85 = vector.load %arg11[%c11, %c0_45] : memref<24x32xf32, #tpu.memory_space<vmem>>, vector<8x32xf32>
    %c6_46 = arith.constant 6 : index
    %c0_47 = arith.constant 0 : index
    %86 = vector.load %arg8[%c6_46, %c0_47] : memref<7x32xf32, #tpu.memory_space<vmem>>, vector<1x32xf32>
    %87 = vector.shape_cast %86 : vector<1x32xf32> to vector<32xf32>
    %88 = vector.shape_cast %87 : vector<32xf32> to vector<1x32xf32>
    %89 = vector.broadcast %88 : vector<1x32xf32> to vector<8x32xf32>
    %90 = arith.mulf %85, %89 : vector<8x32xf32>
    %91 = arith.addf %84, %90 : vector<8x32xf32>
    %c0_48 = arith.constant 0 : index
    %c0_49 = arith.constant 0 : index
    %92 = vector.load %arg9[%c0_48, %c0_49] : memref<1x32xf32, #tpu.memory_space<vmem>>, vector<1x32xf32>
    %93 = vector.broadcast %92 : vector<1x32xf32> to vector<8x32xf32>
    %94 = arith.addf %91, %93 : vector<8x32xf32>
    %cst_50 = arith.constant 5.000000e-01 : f32
    %95 = vector.broadcast %cst_50 : f32 to vector<8x32xf32>
    %96 = arith.mulf %95, %94 : vector<8x32xf32>
    %cst_51 = arith.constant 0.707106769 : f32
    %97 = vector.broadcast %cst_51 : f32 to vector<8x32xf32>
    %98 = arith.mulf %94, %97 : vector<8x32xf32>
    %99 = math.erf %98 : vector<8x32xf32>
    %cst_52 = arith.constant 1.000000e+00 : f32
    %100 = vector.broadcast %cst_52 : f32 to vector<8x32xf32>
    %101 = arith.addf %100, %99 : vector<8x32xf32>
    %102 = arith.mulf %96, %101 : vector<8x32xf32>
    %cst_53 = arith.constant 0.000000e+00 : f32
    %103 = vector.shape_cast %6 : vector<8x1xi1> to vector<8x1xi1>
    %104 = vector.broadcast %103 : vector<8x1xi1> to vector<8x32xi1>
    %105 = vector.broadcast %cst_53 : f32 to vector<8x32xf32>
    %106 = arith.select %104, %102, %105 : vector<8x32xi1>, vector<8x32xf32>
    %c0_54 = arith.constant 0 : index
    %c0_55 = arith.constant 0 : index
    %c0_56 = arith.constant 0 : index
    %107 = vector.load %arg10[%c0_54, %c0_55, %c0_56] : memref<1x8x32xf32, #tpu.memory_space<vmem>>, vector<1x8x32xf32>
    %108 = vector.shape_cast %107 : vector<1x8x32xf32> to vector<8x32xf32>
    %109 = vector.shape_cast %106 : vector<8x32xf32> to vector<1x8x32xf32>
    tpu.vector_store %arg10[%c0_54, %c0_55, %c0_56], %109 {strides = array<i32>} : memref<1x8x32xf32, #tpu.memory_space<vmem>>, vector<1x8x32xf32>,
    return
  }
  func.func @transform_0(%arg0: i32, %arg1: i32) -> (i32, i32, i32) {
    %c0_i32 = arith.constant 0 : i32
    %c0_i32_0 = arith.constant 0 : i32
    return %arg0, %arg1, %c0_i32 : i32, i32, i32
  }
  func.func @transform_1(%arg0: i32, %arg1: i32) -> (i32, i32, i32) {
    %c1_i32 = arith.constant 1 : i32
    %0 = arith.muli %arg1, %c1_i32 : i32
    %c1_i32_0 = arith.constant 1 : i32
    %1 = arith.subi %0, %c1_i32_0 : i32
    %c0_i32 = arith.constant 0 : i32
    %2 = arith.maxsi %1, %c0_i32 : i32
    %c0_i32_1 = arith.constant 0 : i32
    %c0_i32_2 = arith.constant 0 : i32
    return %arg0, %2, %c0_i32_1 : i32, i32, i32
  }
  func.func @transform_2(%arg0: i32, %arg1: i32) -> (i32, i32, i32) {
    %c1_i32 = arith.constant 1 : i32
    %0 = arith.addi %arg1, %c1_i32 : i32
    %c1_i32_0 = arith.constant 1 : i32
    %1 = arith.muli %0, %c1_i32_0 : i32
    %c0_i32 = arith.constant 0 : i32
    %2 = arith.minsi %1, %c0_i32 : i32
    %c0_i32_1 = arith.constant 0 : i32
    %c0_i32_2 = arith.constant 0 : i32
    return %arg0, %2, %c0_i32_1 : i32, i32, i32
  }
  func.func @transform_3(%arg0: i32, %arg1: i32) -> (i32, i32, i32) {
    %c0_i32 = arith.constant 0 : i32
    %c0_i32_0 = arith.constant 0 : i32
    return %arg0, %arg1, %c0_i32 : i32, i32, i32
  }
  func.func @transform_4(%arg0: i32, %arg1: i32) -> (i32, i32, i32) {
    %c1_i32 = arith.constant 1 : i32
    %0 = arith.muli %arg1, %c1_i32 : i32
    %c1_i32_0 = arith.constant 1 : i32
    %1 = arith.subi %0, %c1_i32_0 : i32
    %c0_i32 = arith.constant 0 : i32
    %2 = arith.maxsi %1, %c0_i32 : i32
    %c0_i32_1 = arith.constant 0 : i32
    %c0_i32_2 = arith.constant 0 : i32
    return %arg0, %2, %c0_i32_1 : i32, i32, i32
  }
  func.func @transform_5(%arg0: i32, %arg1: i32) -> (i32, i32, i32) {
    %c1_i32 = arith.constant 1 : i32
    %0 = arith.addi %arg1, %c1_i32 : i32
    %c1_i32_0 = arith.constant 1 : i32
    %1 = arith.muli %0, %c1_i32_0 : i32
    %c0_i32 = arith.constant 0 : i32
    %2 = arith.minsi %1, %c0_i32 : i32
    %c0_i32_1 = arith.constant 0 : i32
    %c0_i32_2 = arith.constant 0 : i32
    return %arg0, %2, %c0_i32_1 : i32, i32, i32
  }
  func.func @transform_6(%arg0: i32, %arg1: i32) -> (i32, i32) {
    %c0_i32 = arith.constant 0 : i32
    %c0_i32_0 = arith.constant 0 : i32
    %c0_i32_1 = arith.constant 0 : i32
    return %c0_i32, %c0_i32_0 : i32, i32
  }
  func.func @transform_7(%arg0: i32, %arg1: i32) -> (i32, i32) {
    %c0_i32 = arith.constant 0 : i32
    %c0_i32_0 = arith.constant 0 : i32
    %c0_i32_1 = arith.constant 0 : i32
    return %c0_i32, %c0_i32_0 : i32, i32
  }
  func.func @transform_8(%arg0: i32, %arg1: i32) -> (i32, i32, i32) {
    %c0_i32 = arith.constant 0 : i32
    %c0_i32_0 = arith.constant 0 : i32
    return %arg0, %arg1, %c0_i32 : i32, i32, i32
  }
}

</mosaic_0001>

<bundles_post_ra>
// kernel: tpu_custom_call.1
= control target key start
LH: loop header
LB: loop body
LE: loop exit
PB: predicated region body
PF: predicated region fallthrough
CT: control target
= control target key end

     0   :  { %13 = vsyncpa [#allocation4], 0  ;;  %s1206_s0 = inlined_call_operand.vmem [shape: f32[2,8,32], index: 0, kind: input, shape index: {}]   ;;  %s1207_s1 = inlined_call_operand.vmem [shape: f32[2,8,32], index: 1, kind: input, shape index: {}]   ;;  %s1208_s2 = inlined_call_operand.vmem [shape: f32[2,8,32], index: 2, kind: input, shape index: {}]   ;;  %s1209_s3 = inlined_call_operand.vmem [shape: f32[2,8,1], index: 3, kind: input, shape index: {}]   ;;  %s1210_s4 = inlined_call_operand.vmem [shape: f32[2,8,1], index: 4, kind: input, shape index: {}]   ;;  %s1211_s5 = inlined_call_operand.vmem [shape: f32[2,8,1], index: 5, kind: input, shape index: {}]   ;;  %s1212_s6 = inlined_call_operand.vmem [shape: f32[7,32], index: 6, kind: input, shape index: {}]   ;;  %s1213_s7 = inlined_call_operand.vmem [shape: f32[1,32], index: 7, kind: input, shape index: {}]   ;;  %s1214_s8 = inlined_call_operand.hbm [shape: f32[2,8,32], index: 8, kind: output, shape index: {}]  }
   0x1   :  { %15 = vsyncpa [#allocation4 + $0x1], 0  ;;  %s1061_s2 = smov 0   ;;  %s1063_s26 = smov 0  }
   0x2   :  { %s1065_s27 = smov 0   ;;  %s1067_s4 = smov 0  }
   0x3   :  { %s1069_s5 = smov 0   ;;  %s1071_s28 = smov 0  }
   0x4 LB: > { %s849_s29 = sadd.s32 4294967295, %s1011_s28   ;;  %s850_s30 = sadd.s32 4294967294, %s1011_s28   ;;  %s1011_s28 = sphi %s1071_s28, %s21_s28   ;;  %s1007_s5 = sphi %s1069_s5, %s1221_s5   ;;  %s1003_s4 = sphi %s1067_s4, %s1220_s4   ;;  %s999_s27 = sphi %s1065_s27, %s1219_s27   ;;  %s995_s26 = sphi %s1063_s26, %s1218_s26   ;;  %s991_s2 = sphi %s1061_s2, %s1217_s2  }
   0x5   : > { %s33_s9 = sadd.s32 1, %s1007_s5  ;;  %s276_s10 = sadd.s32 1, %s999_s27 }
   0x6   : > { %p35_p0 = scmp.ge.s32.totalorder %s33_s9, 2  ;;  %p286_p1 = scmp.ne.s32.totalorder %s999_s27, %s995_s26 }
   0x7   : > { %p287_p2 = scmp.eq.s32.totalorder %s849_s29, 1  ;;  %p292_p3 = scmp.ne.s32.totalorder %s995_s26, %s991_s2 }
   0x8   : > { %s1223_s9 = smov (%p35_p0, %s33_s9), 0  ;;  %p293_p5 = scmp.eq.s32.totalorder %s850_s30, 1 }
   0x9   : > { %p1101_p4 = por %p287_p2, %p286_p1  ;;  %s271_s12 = ssub.s32 %s1007_s5, %s1223_s9 }
   0xa   : > { %p853_p6 = scmp.ge.s32.totalorder %s1011_s28, 1  ;;  %p274_p7 = scmp.eq.s32.totalorder %s271_s12, 0 }
   0xb   : > { %p1108_p8 = por %p293_p5, %p292_p3  ;;  %p401_p9 = scmp.lt.s32.totalorder %s1011_s28, 3 }
   0xc   : > { %s1114_s14 = scalar_select %p274_p7, %s999_s27, %s276_s10  }
   0xd   : > { %p402_p10 = pnand %p853_p6, %p401_p9 }
   0xe   : > { %p484_p11 = scmp.lt.s32.totalorder (!%p402_p10), %s1003_s4, 1  ;;  %vm560_vm0 = vcmask (!%p402_p10), 261120   ;;  %v1013_v0 = vmov (!%p402_p10), 0   ;;  %v1014_v1 = vmov (!%p402_p10), 0.0   ;;  %v861_v7 = vld [vmem:[%s1212_s6] ss:$0 sm:$0xff] (!%p402_p10) }
   0xf   : > { %405 = sbr.rel (%p402_p10) target bundleno = 216 (0xd8), region = 52  ;;  %930 = vset.pattern.permute.xlu0 (!%p402_p10), %v1013_v0  ;;  %584 = vst.msk [vmem:[#allocation2] sm:$0xff] (!%p402_p10), %vm560_vm0, %v1014_v1  ;;  %612 = vst.msk [vmem:[#allocation2 + $0x10] sm:$0xff] (!%p402_p10), %vm560_vm0, %v1014_v1  ;;  %v862_v8 = vld [vmem:[%s1212_s6 + $0x1] ss:$0 sm:$0xff] (!%p402_p10)  ;;  %s481_s23 = sand.u32 (!%p402_p10), 1, %s995_s26  }
  0x10   : > { %v863_v9 = vld [vmem:[%s1212_s6 + $0x2] ss:$0 sm:$0xff] (!%p402_p10)  ;;  %v864_v15 = vld [vmem:[%s1212_s6 + $0x3] ss:$0 sm:$0xff] (!%p402_p10)  ;;  %v865_v19 = vld [vmem:[%s1212_s6 + $0x4] ss:$0 sm:$0xff] (!%p402_p10) }
  0x11   : > { %v866_v23 = vld [vmem:[%s1212_s6 + $0x5] ss:$0 sm:$0xff] (!%p402_p10)  ;;  %v867_v27 = vld [vmem:[%s1212_s6 + $0x6] ss:$0 sm:$0xff] (!%p402_p10)  ;;  %v868_v33 = vld [vmem:[%s1213_s7] ss:$0 sm:$0xff] (!%p402_p10) }
  0x12   : > { %s854_s24 = sshll.u32 (!%p402_p10), %s481_s23, 3  ;;  %s870_s25 = sshll.u32 (!%p402_p10), %s1003_s4, 7 }
  0x13   : > { %s483_s1 = scalar_lea.vmem (!%p402_p10), [#allocation3], %s854_s24  ;;  %s1157_s12 = scalar_lea.hbm (!%p402_p10), %s1214_s8, %s870_s25 }
  0x14   : > { %s703_s29 = sshll.u32 (!%p402_p10), %s483_s1, 4  ;;  %s1159_s29 = int_to_ptr.vmem [resolvable:$true] %s703_s29 }
  0x16   : > { %s485_s15 = scalar_select %p484_p11, %s1003_s4, 1 }
  0x17   : > { %s1015_s4 = smov [#allocation3]  }
  0x18   : > { %s855_s16 = sshll.u32 %s485_s15, 3  ;;  %s689_s15 = scalar_lea.sflag [#allocation4], %s481_s23 }
  0x19   : > { %s523_s19 = scalar_lea.vmem %s1209_s3, %s855_s16  ;;  %s490_s22 = scalar_lea.vmem %s1206_s0, %s855_s16 }
  0x1a   : > { %v552_v2 = vld [vmem:[%s523_s19] sm:$0xff]  ;;  %s933_s16 = scalar_lea.vmem %s1159_s29, 128  ;;  %s937_s17 = sshll.u32 %s1015_s4, 4  ;;  %s938_s17 = int_to_ptr.vmem [resolvable:$false] %s937_s17 }
  0x1b   : > { %vm553_vm1 = vcmp.ne.f32.partialorder %v552_v2, 0.0  ;;  %v551_v4 = vld [vmem:[%s490_s22] sm:$0xff]  ;;  %p934_p12 = scmp.ne.s32.totalorder %s1159_s29, %s933_s16  ;;  %s939_s18 = scalar_lea.vmem %s938_s17, 256 }
  0x1c   : > { %v554_v3 = vsel %vm553_vm1, 1, %v1013_v0  ;;  %p940_p1 = scmp.lt.s32.totalorder %s1159_s29, %s938_s17  ;;  %p941_p2 = scmp.lt.s32.totalorder %s939_s18, %s933_s16 }
  0x1d   : > { %556 = vperm.xlu0 %930, %v554_v3   ;;  %p935_p13 = pnand %p934_p12, %p1101_p4 }
  0x1e   : > { %p942_p3 = por %p941_p2, %p940_p1 }
  0x1f   : > { %p936_p0 = pneg %p935_p13 }
  0x21   : > { %p943_p5 = pnand %p942_p3, %p936_p0 }
  0x9c   : > { %v557_v5 = vpop.permute.xlu0 %556 }
  0x9d   : > { %vm558_vm2 = vcmp.eq.s32.totalorder %v557_v5, 1 }
  0x9e   : > { %v559_v6 = vsel %vm558_vm2, %v551_v4, 0.0 }
  0x9f   : > { %561 = vst.msk [vmem:[#allocation2 + $0x8] sm:$0xff] %vm560_vm0, %v559_v6 }
  0xa6   : > { %v618_v10 = vld [vmem:[#allocation2 + $0x5] sm:$0xff] }
  0xa7   : > { %v625_v11 = vld [vmem:[#allocation2 + $0x6] sm:$0xff]  ;;  %v624_v13 = vmul.f32 %v861_v7, %v618_v10 }
  0xa8   : > { %v633_v12 = vld [vmem:[#allocation2 + $0x7] sm:$0xff]  ;;  %v631_v14 = vmul.f32 %v862_v8, %v625_v11 }
  0xa9   : > { %v641_v16 = vld [vmem:[#allocation2 + $0x8] sm:$0xff]  ;;  %v639_v18 = vmul.f32 %v863_v9, %v633_v12 }
  0xaa   : > { %v632_v17 = vadd.f32 %v631_v14, %v624_v13  ;;  %v649_v20 = vld [vmem:[#allocation2 + $0x9] sm:$0xff]  ;;  %v647_v22 = vmul.f32 %v864_v15, %v641_v16 }
  0xab   : > { %v657_v24 = vld [vmem:[#allocation2 + $0xa] sm:$0xff]  ;;  %v655_v26 = vmul.f32 %v865_v19, %v649_v20 }
  0xac   : > { %v640_v21 = vadd.f32 %v639_v18, %v632_v17  ;;  %v665_v28 = vld [vmem:[#allocation2 + $0xb] sm:$0xff]  ;;  %v663_v30 = vmul.f32 %v866_v23, %v657_v24 }
  0xad   : > { %v671_v32 = vmul.f32 %v867_v27, %v665_v28 }
  0xae   : > { %v648_v25 = vadd.f32 %v647_v22, %v640_v21 }
  0xb0   : > { %v656_v29 = vadd.f32 %v655_v26, %v648_v25 }
  0xb2   : > { %v664_v31 = vadd.f32 %v663_v30, %v656_v29 }
  0xb4   : > { %v672_v34 = vadd.f32 %v671_v32, %v664_v31 }
  0xb6   : > { %v680_v35 = vadd.f32 %v868_v33, %v672_v34 }
  0xb8   : > { %v682_v36 = vmul.f32 0.70710677, %v680_v35  ;;  %v681_v38 = vmul.f32 0.5, %v680_v35 }
  0xba   : > { %931 = verf.f32 %v682_v36 }
  0xc4   : > { %v932_v37 = vpop.eup %931 }
  0xc5   : > { %v684_v39 = vadd.f32 1.0, %v932_v37 }
  0xc7   : > { %v685_v40 = vmul.f32 %v684_v39, %v681_v38 }
  0xc9   : > { %v686_v41 = vsel %vm558_vm2, %v685_v40, 0.0 }
  0xca   : > { %687 = vst.msk [vmem:[%s483_s1] sm:$0xff] %vm560_vm0, %v686_v41 }
  0xcb   : > { %946 = shalt.err (!%p943_p5)
}
  0xcc   : > { %s947_s19 = scalar_lea.hbm %s1157_s12, 128  ;;  %s951_s22 = scalar_lea.hbm %s1214_s8, 256 }
  0xcd   : > { %p948_p6 = scmp.ne.s32.totalorder %s1157_s12, %s947_s19  ;;  %p952_p10 = scmp.lt.u32.totalorder %s1157_s12, %s1214_s8 }
  0xce   : > { %p953_p11 = scmp.lt.u32.totalorder %s951_s22, %s947_s19  ;;  %p955_p13 = scmp.lt.u32.totalorder %s947_s19, %s1157_s12 }
  0xcf   : > { %p949_p7 = pnand %p948_p6, %p1101_p4 }
  0xd0   : > { %p954_p12 = por %p953_p11, %p952_p10 }
  0xd1   : > { %p950_p9 = pneg %p949_p7 }
  0xd2   : > { %p956_p0 = por %p955_p13, %p954_p12 }
  0xd4   : > { %p957_p1 = pnand %p956_p0, %p950_p9 }
  0xd6   : > { %960 = shalt.err (!%p957_p1)
}
  0xd7   : > { %873 = dma.vmem_to_hbm [thread:$0]  (%p1101_p4), %s1159_s29, 128, %s1157_s12, %s689_s15  }
  0xd8 PF: > { %p879_p2 = scmp.ge.s32.totalorder %s1011_s28, 2  ;;  %s715_s25 = sand.u32 1, %s991_s2  }
  0xd9   : > { %s716_s1 = scalar_lea.sflag [#allocation4], %s715_s25 }
  0xda   : > { %p876_p3 = pnand %p879_p2, %p1108_p8 }
  0xdc   : > { %986 = dma.done.wait (!%p876_p3), %s716_s1, 128  }
  0xdd   : > { %988 = vsyncadd (!%p876_p3), %s716_s1, 4294967168  ;;  %s21_s28 = sadd.s32 1, %s1011_s28   ;;  %s1217_s2 = smov %s995_s26 }
  0xde   : > { %p18_p5 = scmp.ge.s32.totalorder %s21_s28, 4   ;;  %s1218_s26 = smov %s999_s27 }
  0xdf   : > { %s1219_s27 = smov %s1114_s14  ;;  %s1220_s4 = smov %s1007_s5 }
  0xe0   : > { %s1221_s5 = smov %s1223_s9  ;;  %20 = sbr.rel (!%p18_p5) target bundleno = 4 (0x4), region = 118 }
  0xe7   :  { %721 = vsyncpa [#allocation4], 1 }
  0xe8   :  { %723 = vsyncpa [#allocation4 + $0x1], 1 }

</bundles_post_ra>
